<compile_context>
chip_gen: v7x
topology: tpu7x:2x2x1
jax: 0.10.0
libtpu: 0.0.40
codegen_flags: <defaults>
</compile_context>

<pallas_src>
import functools

import jax
import jax.numpy as jnp
from jax import lax
from jax.experimental import pallas as pl
from jax.experimental.pallas import tpu as pltpu

SEQ = 8
BATCH = 2
INPUT = 1
HIDDEN = 50

B_PAD = 8     # pad batch to a full sublane group
H_PAD = 128   # pad hidden to a full lane group (one f32 vreg row)


def rnn_kernel(x_ref, wb_ref, whh_ref, out_ref, *, seq):
    """Whole recurrence in one invocation (no grid).

    x_ref   : (seq, B_PAD, 1)    inputs, batch zero-padded to B_PAD
    wb_ref  : (B_PAD, H_PAD)     row 0 = W_ih^T (zero-padded), row 1 = b_ih + b_hh
    whh_ref : (H_PAD, H_PAD)     W_hh^T zero-padded
    out_ref : (seq, B_PAD, H_PAD) padded hidden-state sequence (lane-dense stores)
    """
    x_all = x_ref[...]                                  # (seq, B_PAD, 1)
    wb = wb_ref[...]                                    # (B_PAD, H_PAD)
    whh = whh_ref[...]                                  # (H_PAD, H_PAD)

    wih = wb[0:1, :]                                    # (1, H_PAD)  W_ih^T
    bias = wb[1:2, :]                                   # (1, H_PAD)  b_ih + b_hh

    # Hoisted input projection: independent of the recurrence, one vectorized VPU pass.
    # (seq, B_PAD, 1) * (1, 1, H_PAD) + (1, 1, H_PAD) -> (seq, B_PAD, H_PAD)
    pre = x_all * wih[jnp.newaxis] + bias[jnp.newaxis]

    # seq is small & static: fully unrolled straight-line recurrence; h lives in vregs.
    h = jnp.zeros((B_PAD, H_PAD), jnp.float32)
    for t in range(seq):
        h = jnp.tanh(pre[t] + jnp.dot(h, whh, preferred_element_type=jnp.float32))
        out_ref[t] = h                                  # full-tile, unmasked store


def prepare_rnn_params(w_ih, w_hh, b_ih, b_hh):
    """One-time layout plumbing: pad weights to vreg/MXU-native tiles.

    PyTorch convention: w_ih (HIDDEN, INPUT=1), w_hh (HIDDEN, HIDDEN),
                        b_ih (HIDDEN,), b_hh (HIDDEN,).
    Zero padding is mathematically inert for the valid region.
    """
    hidden = w_ih.shape[0]
    assert hidden <= H_PAD and w_ih.shape[1] == 1
    f32 = jnp.float32
    wb = jnp.zeros((B_PAD, H_PAD), f32)
    wb = wb.at[0, :hidden].set(w_ih.astype(f32)[:, 0])             # W_ih^T row
    wb = wb.at[1, :hidden].set((b_ih + b_hh).astype(f32))          # merged bias row
    whh_t = jnp.zeros((H_PAD, H_PAD), f32).at[:hidden, :hidden].set(w_hh.astype(f32).T)
    return wb, whh_t


@jax.jit
def vanilla_rnn_forward(x, wb, whh_t):
    """x: (seq, batch, 1).  wb/whh_t: pre-padded params from prepare_rnn_params."""
    seq, batch, inp = x.shape
    assert inp == INPUT and batch <= B_PAD

    # Only per-call prep: zero-pad the batch sublanes of x (per-call data anyway).
    x_pad = jnp.zeros((seq, B_PAD, inp), jnp.float32).at[:, :batch, :].set(
        x.astype(jnp.float32))

    flops = 2 * seq * B_PAD * H_PAD * H_PAD
    transcendentals = seq * B_PAD * H_PAD
    bytes_accessed = 4 * (seq * B_PAD * inp + B_PAD * H_PAD + H_PAD * H_PAD
                          + seq * B_PAD * H_PAD)

    out_pad = pl.pallas_call(
        functools.partial(rnn_kernel, seq=seq),
        out_shape=jax.ShapeDtypeStruct((seq, B_PAD, H_PAD), jnp.float32),
        # No grid: the entire working set (~100 KiB) sits in VMEM for one invocation.
        in_specs=[
            pl.BlockSpec(memory_space=pltpu.MemorySpace.VMEM),
            pl.BlockSpec(memory_space=pltpu.MemorySpace.VMEM),
            pl.BlockSpec(memory_space=pltpu.MemorySpace.VMEM),
        ],
        out_specs=pl.BlockSpec(memory_space=pltpu.MemorySpace.VMEM),
        cost_estimate=pl.CostEstimate(flops=flops,
                                      transcendentals=transcendentals,
                                      bytes_accessed=bytes_accessed),
    )(x_pad, wb, whh_t)

    # Padded batch rows contain tanh(bias)-recurrence garbage; padded hidden columns
    # are exactly 0. Either way, slice to the valid region here.
    return out_pad[:, :batch, :HIDDEN].astype(x.dtype)


def rnn_reference(x, w_ih, w_hh, b_ih, b_hh):
    """Pure-JAX reference matching torch.nn.RNN forward (h_0 = 0)."""
    def step(h, x_t):
        h_new = jnp.tanh(x_t @ w_ih.T + b_ih + h @ w_hh.T + b_hh)
        return h_new, h_new
    h0 = jnp.zeros((x.shape[1], w_hh.shape[0]), jnp.float32)
    _, ys = lax.scan(step, h0, x)
    return ys


if __name__ == "__main__":
    key = jax.random.PRNGKey(0)
    k_x, k_wih, k_whh, k_bih, k_bhh = jax.random.split(key, 5)

    # Deterministic parameter init mimicking PyTorch default: U(-1/sqrt(H), 1/sqrt(H)).
    bound = 1.0 / jnp.sqrt(jnp.float32(HIDDEN))
    w_ih = jax.random.uniform(k_wih, (HIDDEN, INPUT), jnp.float32, -bound, bound)
    w_hh = jax.random.uniform(k_whh, (HIDDEN, HIDDEN), jnp.float32, -bound, bound)
    b_ih = jax.random.uniform(k_bih, (HIDDEN,), jnp.float32, -bound, bound)
    b_hh = jax.random.uniform(k_bhh, (HIDDEN,), jnp.float32, -bound, bound)

    x = jax.random.normal(k_x, (SEQ, BATCH, INPUT), jnp.float32)

    # Hoisted (one-time) weight padding; the hot path is just vanilla_rnn_forward.
    wb, whh_t = prepare_rnn_params(w_ih, w_hh, b_ih, b_hh)
    wb, whh_t = jax.block_until_ready((wb, whh_t))

    out = vanilla_rnn_forward(x, wb, whh_t)
    out = jax.block_until_ready(out)

    ref = jax.block_until_ready(rnn_reference(x, w_ih, w_hh, b_ih, b_hh))
    assert out.shape == (SEQ, BATCH, HIDDEN)
    assert jnp.allclose(out, ref, atol=1e-5, rtol=1e-5), "mismatch vs reference"

    print("KERNEL_OK")
</pallas_src>

<mosaic_0001>
module attributes {stable_mosaic.version = 11 : i64} {
  func.func @rnn_kernel(%arg0: memref<8x8x1xf32, #tpu.memory_space<vmem>>, %arg1: memref<8x128xf32, #tpu.memory_space<vmem>>, %arg2: memref<128x128xf32, #tpu.memory_space<vmem>>, %arg3: memref<8x8x128xf32, #tpu.memory_space<vmem>>) attributes {dimension_semantics = [], scalar_prefetch = 0 : i64, scratch_operands = 0 : i64, tpu.core_type = #tpu.core_type<tc>} {
    %c0 = arith.constant 0 : index
    %c0_0 = arith.constant 0 : index
    %c0_1 = arith.constant 0 : index
    %0 = vector.load %arg0[%c0, %c0_0, %c0_1] : memref<8x8x1xf32, #tpu.memory_space<vmem>>, vector<8x8x1xf32>
    %c0_2 = arith.constant 0 : index
    %c0_3 = arith.constant 0 : index
    %1 = vector.load %arg1[%c0_2, %c0_3] : memref<8x128xf32, #tpu.memory_space<vmem>>, vector<8x128xf32>
    %c0_4 = arith.constant 0 : index
    %c0_5 = arith.constant 0 : index
    %2 = vector.load %arg2[%c0_4, %c0_5] : memref<128x128xf32, #tpu.memory_space<vmem>>, vector<128x128xf32>
    %3 = vector.extract_strided_slice %1 {offsets = [0, 0], sizes = [1, 128], strides = [1, 1]} : vector<8x128xf32> to vector<1x128xf32>
    %4 = vector.extract_strided_slice %1 {offsets = [1, 0], sizes = [1, 128], strides = [1, 1]} : vector<8x128xf32> to vector<1x128xf32>
    %5 = vector.shape_cast %3 : vector<1x128xf32> to vector<1x1x128xf32>
    %6 = vector.broadcast %0 : vector<8x8x1xf32> to vector<8x8x128xf32>
    %7 = vector.broadcast %5 : vector<1x1x128xf32> to vector<8x8x128xf32>
    %8 = arith.mulf %6, %7 : vector<8x8x128xf32>
    %9 = vector.shape_cast %4 : vector<1x128xf32> to vector<1x1x128xf32>
    %10 = vector.broadcast %9 : vector<1x1x128xf32> to vector<8x8x128xf32>
    %11 = arith.addf %8, %10 : vector<8x8x128xf32>
    %cst = arith.constant 0.000000e+00 : f32
    %12 = vector.broadcast %cst : f32 to vector<8x128xf32>
    %13 = vector.extract_strided_slice %11 {offsets = [0, 0, 0], sizes = [1, 8, 128], strides = [1, 1, 1]} : vector<8x8x128xf32> to vector<1x8x128xf32>
    %14 = vector.shape_cast %13 : vector<1x8x128xf32> to vector<8x128xf32>
    %cst_6 = arith.constant dense<0.000000e+00> : vector<8x128xf32>
    %15 = tpu.matmul %12, %2, %cst_6 {dimension_numbers = #tpu.dot_dimension_numbers<[1], [0], [0], [1], [0, 0, 1, 1], [], []>} : vector<8x128xf32>, vector<128x128xf32>, vector<8x128xf32> -> vector<8x128xf32>
    %16 = arith.addf %14, %15 : vector<8x128xf32>
    %17 = math.tanh %16 : vector<8x128xf32>
    %c0_7 = arith.constant 0 : index
    %c0_8 = arith.constant 0 : index
    %c0_9 = arith.constant 0 : index
    %18 = vector.load %arg3[%c0_7, %c0_8, %c0_9] : memref<8x8x128xf32, #tpu.memory_space<vmem>>, vector<1x8x128xf32>
    %19 = vector.shape_cast %18 : vector<1x8x128xf32> to vector<8x128xf32>
    %20 = vector.shape_cast %17 : vector<8x128xf32> to vector<1x8x128xf32>
    tpu.vector_store %arg3[%c0_7, %c0_8, %c0_9], %20 {strides = array<i32>} : memref<8x8x128xf32, #tpu.memory_space<vmem>>, vector<1x8x128xf32>,
    %21 = vector.extract_strided_slice %11 {offsets = [1, 0, 0], sizes = [1, 8, 128], strides = [1, 1, 1]} : vector<8x8x128xf32> to vector<1x8x128xf32>
    %22 = vector.shape_cast %21 : vector<1x8x128xf32> to vector<8x128xf32>
    %cst_10 = arith.constant dense<0.000000e+00> : vector<8x128xf32>
    %23 = tpu.matmul %17, %2, %cst_10 {dimension_numbers = #tpu.dot_dimension_numbers<[1], [0], [0], [1], [0, 0, 1, 1], [], []>} : vector<8x128xf32>, vector<128x128xf32>, vector<8x128xf32> -> vector<8x128xf32>
    %24 = arith.addf %22, %23 : vector<8x128xf32>
    %25 = math.tanh %24 : vector<8x128xf32>
    %c1 = arith.constant 1 : index
    %c0_11 = arith.constant 0 : index
    %c0_12 = arith.constant 0 : index
    %26 = vector.load %arg3[%c1, %c0_11, %c0_12] : memref<8x8x128xf32, #tpu.memory_space<vmem>>, vector<1x8x128xf32>
    %27 = vector.shape_cast %26 : vector<1x8x128xf32> to vector<8x128xf32>
    %28 = vector.shape_cast %25 : vector<8x128xf32> to vector<1x8x128xf32>
    tpu.vector_store %arg3[%c1, %c0_11, %c0_12], %28 {strides = array<i32>} : memref<8x8x128xf32, #tpu.memory_space<vmem>>, vector<1x8x128xf32>,
    %29 = vector.extract_strided_slice %11 {offsets = [2, 0, 0], sizes = [1, 8, 128], strides = [1, 1, 1]} : vector<8x8x128xf32> to vector<1x8x128xf32>
    %30 = vector.shape_cast %29 : vector<1x8x128xf32> to vector<8x128xf32>
    %cst_13 = arith.constant dense<0.000000e+00> : vector<8x128xf32>
    %31 = tpu.matmul %25, %2, %cst_13 {dimension_numbers = #tpu.dot_dimension_numbers<[1], [0], [0], [1], [0, 0, 1, 1], [], []>} : vector<8x128xf32>, vector<128x128xf32>, vector<8x128xf32> -> vector<8x128xf32>
    %32 = arith.addf %30, %31 : vector<8x128xf32>
    %33 = math.tanh %32 : vector<8x128xf32>
    %c2 = arith.constant 2 : index
    %c0_14 = arith.constant 0 : index
    %c0_15 = arith.constant 0 : index
    %34 = vector.load %arg3[%c2, %c0_14, %c0_15] : memref<8x8x128xf32, #tpu.memory_space<vmem>>, vector<1x8x128xf32>
    %35 = vector.shape_cast %34 : vector<1x8x128xf32> to vector<8x128xf32>
    %36 = vector.shape_cast %33 : vector<8x128xf32> to vector<1x8x128xf32>
    tpu.vector_store %arg3[%c2, %c0_14, %c0_15], %36 {strides = array<i32>} : memref<8x8x128xf32, #tpu.memory_space<vmem>>, vector<1x8x128xf32>,
    %37 = vector.extract_strided_slice %11 {offsets = [3, 0, 0], sizes = [1, 8, 128], strides = [1, 1, 1]} : vector<8x8x128xf32> to vector<1x8x128xf32>
    %38 = vector.shape_cast %37 : vector<1x8x128xf32> to vector<8x128xf32>
    %cst_16 = arith.constant dense<0.000000e+00> : vector<8x128xf32>
    %39 = tpu.matmul %33, %2, %cst_16 {dimension_numbers = #tpu.dot_dimension_numbers<[1], [0], [0], [1], [0, 0, 1, 1], [], []>} : vector<8x128xf32>, vector<128x128xf32>, vector<8x128xf32> -> vector<8x128xf32>
    %40 = arith.addf %38, %39 : vector<8x128xf32>
    %41 = math.tanh %40 : vector<8x128xf32>
    %c3 = arith.constant 3 : index
    %c0_17 = arith.constant 0 : index
    %c0_18 = arith.constant 0 : index
    %42 = vector.load %arg3[%c3, %c0_17, %c0_18] : memref<8x8x128xf32, #tpu.memory_space<vmem>>, vector<1x8x128xf32>
    %43 = vector.shape_cast %42 : vector<1x8x128xf32> to vector<8x128xf32>
    %44 = vector.shape_cast %41 : vector<8x128xf32> to vector<1x8x128xf32>
    tpu.vector_store %arg3[%c3, %c0_17, %c0_18], %44 {strides = array<i32>} : memref<8x8x128xf32, #tpu.memory_space<vmem>>, vector<1x8x128xf32>,
    %45 = vector.extract_strided_slice %11 {offsets = [4, 0, 0], sizes = [1, 8, 128], strides = [1, 1, 1]} : vector<8x8x128xf32> to vector<1x8x128xf32>
    %46 = vector.shape_cast %45 : vector<1x8x128xf32> to vector<8x128xf32>
    %cst_19 = arith.constant dense<0.000000e+00> : vector<8x128xf32>
    %47 = tpu.matmul %41, %2, %cst_19 {dimension_numbers = #tpu.dot_dimension_numbers<[1], [0], [0], [1], [0, 0, 1, 1], [], []>} : vector<8x128xf32>, vector<128x128xf32>, vector<8x128xf32> -> vector<8x128xf32>
    %48 = arith.addf %46, %47 : vector<8x128xf32>
    %49 = math.tanh %48 : vector<8x128xf32>
    %c4 = arith.constant 4 : index
    %c0_20 = arith.constant 0 : index
    %c0_21 = arith.constant 0 : index
    %50 = vector.load %arg3[%c4, %c0_20, %c0_21] : memref<8x8x128xf32, #tpu.memory_space<vmem>>, vector<1x8x128xf32>
    %51 = vector.shape_cast %50 : vector<1x8x128xf32> to vector<8x128xf32>
    %52 = vector.shape_cast %49 : vector<8x128xf32> to vector<1x8x128xf32>
    tpu.vector_store %arg3[%c4, %c0_20, %c0_21], %52 {strides = array<i32>} : memref<8x8x128xf32, #tpu.memory_space<vmem>>, vector<1x8x128xf32>,
    %53 = vector.extract_strided_slice %11 {offsets = [5, 0, 0], sizes = [1, 8, 128], strides = [1, 1, 1]} : vector<8x8x128xf32> to vector<1x8x128xf32>
    %54 = vector.shape_cast %53 : vector<1x8x128xf32> to vector<8x128xf32>
    %cst_22 = arith.constant dense<0.000000e+00> : vector<8x128xf32>
    %55 = tpu.matmul %49, %2, %cst_22 {dimension_numbers = #tpu.dot_dimension_numbers<[1], [0], [0], [1], [0, 0, 1, 1], [], []>} : vector<8x128xf32>, vector<128x128xf32>, vector<8x128xf32> -> vector<8x128xf32>
    %56 = arith.addf %54, %55 : vector<8x128xf32>
    %57 = math.tanh %56 : vector<8x128xf32>
    %c5 = arith.constant 5 : index
    %c0_23 = arith.constant 0 : index
    %c0_24 = arith.constant 0 : index
    %58 = vector.load %arg3[%c5, %c0_23, %c0_24] : memref<8x8x128xf32, #tpu.memory_space<vmem>>, vector<1x8x128xf32>
    %59 = vector.shape_cast %58 : vector<1x8x128xf32> to vector<8x128xf32>
    %60 = vector.shape_cast %57 : vector<8x128xf32> to vector<1x8x128xf32>
    tpu.vector_store %arg3[%c5, %c0_23, %c0_24], %60 {strides = array<i32>} : memref<8x8x128xf32, #tpu.memory_space<vmem>>, vector<1x8x128xf32>,
    %61 = vector.extract_strided_slice %11 {offsets = [6, 0, 0], sizes = [1, 8, 128], strides = [1, 1, 1]} : vector<8x8x128xf32> to vector<1x8x128xf32>
    %62 = vector.shape_cast %61 : vector<1x8x128xf32> to vector<8x128xf32>
    %cst_25 = arith.constant dense<0.000000e+00> : vector<8x128xf32>
    %63 = tpu.matmul %57, %2, %cst_25 {dimension_numbers = #tpu.dot_dimension_numbers<[1], [0], [0], [1], [0, 0, 1, 1], [], []>} : vector<8x128xf32>, vector<128x128xf32>, vector<8x128xf32> -> vector<8x128xf32>
    %64 = arith.addf %62, %63 : vector<8x128xf32>
    %65 = math.tanh %64 : vector<8x128xf32>
    %c6 = arith.constant 6 : index
    %c0_26 = arith.constant 0 : index
    %c0_27 = arith.constant 0 : index
    %66 = vector.load %arg3[%c6, %c0_26, %c0_27] : memref<8x8x128xf32, #tpu.memory_space<vmem>>, vector<1x8x128xf32>
    %67 = vector.shape_cast %66 : vector<1x8x128xf32> to vector<8x128xf32>
    %68 = vector.shape_cast %65 : vector<8x128xf32> to vector<1x8x128xf32>
    tpu.vector_store %arg3[%c6, %c0_26, %c0_27], %68 {strides = array<i32>} : memref<8x8x128xf32, #tpu.memory_space<vmem>>, vector<1x8x128xf32>,
    %69 = vector.extract_strided_slice %11 {offsets = [7, 0, 0], sizes = [1, 8, 128], strides = [1, 1, 1]} : vector<8x8x128xf32> to vector<1x8x128xf32>
    %70 = vector.shape_cast %69 : vector<1x8x128xf32> to vector<8x128xf32>
    %cst_28 = arith.constant dense<0.000000e+00> : vector<8x128xf32>
    %71 = tpu.matmul %65, %2, %cst_28 {dimension_numbers = #tpu.dot_dimension_numbers<[1], [0], [0], [1], [0, 0, 1, 1], [], []>} : vector<8x128xf32>, vector<128x128xf32>, vector<8x128xf32> -> vector<8x128xf32>
    %72 = arith.addf %70, %71 : vector<8x128xf32>
    %73 = math.tanh %72 : vector<8x128xf32>
    %c7 = arith.constant 7 : index
    %c0_29 = arith.constant 0 : index
    %c0_30 = arith.constant 0 : index
    %74 = vector.load %arg3[%c7, %c0_29, %c0_30] : memref<8x8x128xf32, #tpu.memory_space<vmem>>, vector<1x8x128xf32>
    %75 = vector.shape_cast %74 : vector<1x8x128xf32> to vector<8x128xf32>
    %76 = vector.shape_cast %73 : vector<8x128xf32> to vector<1x8x128xf32>
    tpu.vector_store %arg3[%c7, %c0_29, %c0_30], %76 {strides = array<i32>} : memref<8x8x128xf32, #tpu.memory_space<vmem>>, vector<1x8x128xf32>,
    return
  }
}

</mosaic_0001>

<bundles_post_ra>
// kernel: vanilla_rnn_forward.1
= control target key start
LH: loop header
LB: loop body
LE: loop exit
PB: predicated region body
PF: predicated region fallthrough
CT: control target
= control target key end

     0   :  { %8 = vsyncpa [#allocation3], 0  ;;  %s1377_s12 = smov [#allocation2]   ;;  %s1648_s0 = inlined_call_operand.vmem [shape: f32[8,8,1], index: 0, kind: input, shape index: {}]   ;;  %s1649_s1 = inlined_call_operand.vmem [shape: f32[8,128], index: 1, kind: input, shape index: {}]   ;;  %s1650_s2 = inlined_call_operand.hbm [shape: f32[128,128], index: 2, kind: input, shape index: {}]   ;;  %s1651_s3 = inlined_call_operand.vmem [shape: f32[8,8,128], index: 3, kind: output, shape index: {}]  }
   0x1   :  { %s18_s13 = sshll.u32 %s1377_s12, 4  ;;  %s1353_s16 = scalar_lea.hbm %s1650_s2, 2048  ;;  %s19_s13 = int_to_ptr.vmem [resolvable:$true] %s18_s13 }
   0x2   :  { %p1354_p0 = scmp.ne.s32.totalorder %s1650_s2, %s1353_s16  ;;  %p1357_p1 = scmp.lt.u32.totalorder %s1353_s16, %s1650_s2 }
   0x4   :  { %p1359_p2 = pnand %p1357_p1, %p1354_p0 }
   0x6   :  { %1362 = shalt.err (!%p1359_p2)
}
   0x7   :  { %s1363_s21 = scalar_lea.vmem %s19_s13, 2048  ;;  %p1368_p4 = scmp.lt.s32.totalorder %s19_s13, %s19_s13 }
   0x8   :  { %p1364_p3 = scmp.ne.s32.totalorder %s19_s13, %s1363_s21  ;;  %p1369_p5 = scmp.lt.s32.totalorder %s1363_s21, %s1363_s21 }
   0xa   :  { %p1370_p6 = por %p1369_p5, %p1368_p4 }
   0xc   :  { %p1371_p7 = pnand %p1370_p6, %p1364_p3 }
   0xe   :  { %1374 = shalt.err (!%p1371_p7)
}
   0xf   :  { %s1378_s22 = smov 128   ;;  %s1379_s23 = smov 8  }
  0x10   :  { %24 = dma.hbm_to_vmem [thread:$0]  %s1650_s2, 2048, %s19_s13, [#allocation3], %s1378_s22, %s1378_s22, %s1379_s23  }
  0x11   :  { %1375 = dma.done.wait [#allocation3], 2048  }
  0x12   :  { %1376 = vsyncadd [#allocation3], 4294965248  ;;  %v1380_v0 = vmov 0.0|0.0   ;;  %vm1381_vm0 = vmmov 0   ;;  %v1382_v1 = vmov 0.0   ;;  %v1383_v2 = vmov 0  }
  0x13   :  { %1136 = vmatprep.subr.bf16.mxu0 %v1380_v0  ;;  %888 = vmatprep.mubr.msk.f32.mxu0 %vm1381_vm0, %v1382_v1  ;;  %v37_v3 = vld [vmem:[#allocation2] sm:$0xff]  ;;  %v38_v4 = vld [vmem:[#allocation2 + $0x8] sm:$0xff]  ;;  %v39_v5 = vld [vmem:[#allocation2 + $0x10] sm:$0xff]  ;;  %v93_v31 = vlaneseq }
  0x14   :  { %1335 = vset.pattern.permute.xlu0 %v1383_v2  ;;  %1160 = vmatprep.subr.bf16.mxu1 %v1380_v0  ;;  %v1422_v6 = vpack.c.bf16 %v38_v4, %v37_v3  ;;  %v40_v7 = vld [vmem:[#allocation2 + $0x18] sm:$0xff]  ;;  %v41_v9 = vld [vmem:[#allocation2 + $0x20] sm:$0xff]  ;;  %v42_v10 = vld [vmem:[#allocation2 + $0x28] sm:$0xff] }
  0x15   :  { %923 = vmatprep.mubr.msk.f32.mxu1 %vm1381_vm0, %v1382_v1  ;;  %1336 = vset.pattern.permute.xlu1 %v1383_v2  ;;  %v1425_v8 = vpack.c.bf16 %v40_v7, %v39_v5  ;;  %v28_v11 = vld [vmem:[%s1648_s0] sm:$0xff]  ;;  %v1434_v12 = vpack.c.bf16 %v42_v10, %v41_v9  ;;  %v29_v13 = vld [vmem:[%s1648_s0 + $0x8] sm:$0xff]  ;;  %v43_v14 = vld [vmem:[#allocation2 + $0x30] sm:$0xff]  ;;  %v94_v32 = vshrl.u32 %v93_v31, 7 }
  0x16   :  { %1138 = vmatpush3.bf16.msra.mxu0 %v1422_v6  ;;  %1162 = vmatpush3.bf16.msra.mxu1 %v1422_v6  ;;  %v44_v15 = vld [vmem:[#allocation2 + $0x38] sm:$0xff]  ;;  %v32_v17 = vld [vmem:[%s1648_s0 + $0x20] sm:$0xff]  ;;  %v46_v19 = vld [vmem:[#allocation2 + $0x48] sm:$0xff] }
  0x17   :  { %1139 = vmatprep.subr.bf16.mxu0 %v1380_v0  ;;  %1163 = vmatprep.subr.bf16.mxu1 %v1380_v0  ;;  %v1443_v16 = vpack.c.bf16 %v44_v15, %v43_v14  ;;  %v45_v18 = vld [vmem:[#allocation2 + $0x40] sm:$0xff]  ;;  %v34_v21 = vld [vmem:[%s1648_s0 + $0x30] sm:$0xff]  ;;  %v48_v23 = vld [vmem:[#allocation2 + $0x58] sm:$0xff]  ;;  %v95_v33 = vsub.s32 0, %v94_v32  ;;  %v107_v36 = vsub.s32 1, %v94_v32 }
  0x18   :  { %55 = vperm.xlu0 %1335, %v28_v11   ;;  %v1452_v20 = vpack.c.bf16 %v46_v19, %v45_v18  ;;  %v47_v22 = vld [vmem:[#allocation2 + $0x50] sm:$0xff]  ;;  %v49_v25 = vld [vmem:[#allocation2 + $0x60] sm:$0xff]  ;;  %v50_v26 = vld [vmem:[#allocation2 + $0x68] sm:$0xff] }
  0x19   :  { %v1461_v24 = vpack.c.bf16 %v48_v23, %v47_v22  ;;  %v1467_v27 = vpack.c.bf16 %v50_v26, %v49_v25  ;;  %v51_v28 = vld [vmem:[#allocation2 + $0x70] sm:$0xff]  ;;  %v52_v29 = vld [vmem:[#allocation2 + $0x78] sm:$0xff]  ;;  %v36_v34 = vld [vmem:[%s1649_s1] sm:$0xff] }
  0x1a   :  { %1141 = vmatpush3.bf16.msra.mxu0 %v1425_v8  ;;  %1165 = vmatpush3.bf16.msra.mxu1 %v1425_v8  ;;  %v1473_v30 = vpack.c.bf16 %v52_v29, %v51_v28  ;;  %v1504_v35 = vrot.slane %v36_v34, %v95_v33  ;;  %v1507_v39 = vrot.slane %v36_v34, %v107_v36  ;;  %v30_v45 = vld [vmem:[%s1648_s0 + $0x10] sm:$0xff]  ;;  %v31_v46 = vld [vmem:[%s1648_s0 + $0x18] sm:$0xff]  ;;  %v33_v47 = vld [vmem:[%s1648_s0 + $0x28] sm:$0xff] }
  0x1b   :  { %1142 = vmatprep.subr.bf16.mxu0 %v1380_v0  ;;  %1166 = vmatprep.subr.bf16.mxu1 %v1380_v0  ;;  %v35_v48 = vld [vmem:[%s1648_s0 + $0x38] sm:$0xff] }
  0x1c   :  { %60 = vperm.xlu0 %1335, %v29_v13   ;;  %65 = vperm.xlu1 %1336, %v30_v45  }
  0x1e   :  { %1144 = vmatpush3.bf16.msra.mxu0 %v1434_v12  ;;  %1168 = vmatpush3.bf16.msra.mxu1 %v1434_v12 }
  0x1f   :  { %1145 = vmatprep.subr.bf16.mxu0 %v1380_v0  ;;  %1169 = vmatprep.subr.bf16.mxu1 %v1380_v0 }
  0x20   :  { %75 = vperm.xlu0 %1335, %v32_v17   ;;  %70 = vperm.xlu1 %1336, %v31_v46  }
  0x22   :  { %1147 = vmatpush3.bf16.msra.mxu0 %v1443_v16  ;;  %1171 = vmatpush3.bf16.msra.mxu1 %v1443_v16 }
  0x23   :  { %1148 = vmatprep.subr.bf16.mxu0 %v1380_v0  ;;  %1172 = vmatprep.subr.bf16.mxu1 %v1380_v0 }
  0x24   :  { %85 = vperm.xlu0 %1335, %v34_v21   ;;  %80 = vperm.xlu1 %1336, %v33_v47  }
  0x26   :  { %1150 = vmatpush3.bf16.msra.mxu0 %v1452_v20  ;;  %1174 = vmatpush3.bf16.msra.mxu1 %v1452_v20 }
  0x27   :  { %1151 = vmatprep.subr.bf16.mxu0 %v1380_v0  ;;  %1175 = vmatprep.subr.bf16.mxu1 %v1380_v0 }
  0x28   :  { %90 = vperm.xlu1 %1336, %v35_v48  }
  0x2a   :  { %1153 = vmatpush3.bf16.msra.mxu0 %v1461_v24  ;;  %1177 = vmatpush3.bf16.msra.mxu1 %v1461_v24 }
  0x2b   :  { %1154 = vmatprep.subr.bf16.mxu0 %v1380_v0  ;;  %1178 = vmatprep.subr.bf16.mxu1 %v1380_v0 }
  0x2e   :  { %1156 = vmatpush3.bf16.msra.mxu0 %v1467_v27  ;;  %1180 = vmatpush3.bf16.msra.mxu1 %v1467_v27 }
  0x2f   :  { %1157 = vmatprep.subr.bf16.mxu0 %v1380_v0  ;;  %1181 = vmatprep.subr.bf16.mxu1 %v1380_v0 }
  0x32   :  { %1159 = vmatpush3.bf16.msra.mxu0 %v1473_v30  ;;  %1183 = vmatpush3.bf16.msra.mxu1 %v1473_v30 }
  0x33   :  { %1184 = vmatprep.subr.bf16.mxu0 %v1380_v0  ;;  %1208 = vmatprep.subr.bf16.mxu1 %v1380_v0 }
  0x35   :  { %889 = vmatmul.mubr.f32.vlgmr.msra.gmra.mrb[0].mxu0 %v1382_v1 }
  0x36   :  { %1186 = vmatpush3.bf16.msra.mxu0 %v1422_v6  ;;  %958 = vmatprep.mubr.msk.f32.mxu0 %vm1381_vm0, %v1382_v1 }
  0x37   :  { %1187 = vmatprep.subr.bf16.mxu0 %v1380_v0 }
  0x3a   :  { %1189 = vmatpush3.bf16.msra.mxu0 %v1425_v8 }
  0x3b   :  { %1190 = vmatprep.subr.bf16.mxu0 %v1380_v0 }
  0x3e   :  { %1192 = vmatpush3.bf16.msra.mxu0 %v1434_v12 }
  0x3f   :  { %1193 = vmatprep.subr.bf16.mxu0 %v1380_v0 }
  0x42   :  { %1195 = vmatpush3.bf16.msra.mxu0 %v1443_v16 }
  0x43   :  { %1196 = vmatprep.subr.bf16.mxu0 %v1380_v0 }
  0x46   :  { %1198 = vmatpush3.bf16.msra.mxu0 %v1452_v20 }
  0x47   :  { %1199 = vmatprep.subr.bf16.mxu0 %v1380_v0 }
  0x4a   :  { %1201 = vmatpush3.bf16.msra.mxu0 %v1461_v24 }
  0x4b   :  { %1202 = vmatprep.subr.bf16.mxu0 %v1380_v0 }
  0x4e   :  { %1204 = vmatpush3.bf16.msra.mxu0 %v1467_v27 }
  0x4f   :  { %1205 = vmatprep.subr.bf16.mxu0 %v1380_v0 }
  0x52   :  { %1207 = vmatpush3.bf16.msra.mxu0 %v1473_v30 }
  0x53   :  { %1232 = vmatprep.subr.bf16.mxu0 %v1380_v0 }
  0x97   :  { %v56_v37 = vpop.permute.xlu0 %55 }
  0x98   :  { %v97_v38 = vmul.f32 %v1504_v35, %v56_v37 }
  0x9a   :  { %v109_v40 = vadd.f32 %v1507_v39, %v97_v38 }
  0x9b   :  { %v61_v49 = vpop.permute.xlu0 %60  ;;  %v66_v56 = vpop.permute.xlu1 %65 }
  0x9c   :  { %v98_v50 = vmul.f32 %v1504_v35, %v61_v49  ;;  %v99_v57 = vmul.f32 %v1504_v35, %v66_v56 }
  0x9e   :  { %v110_v51 = vadd.f32 %v1507_v39, %v98_v50  ;;  %v111_v58 = vadd.f32 %v1507_v39, %v99_v57 }
  0x9f   :  { %v71_v63 = vpop.permute.xlu1 %70  ;;  %v76_v10 = vpop.permute.xlu0 %75 }
  0xa0   :  { %v100_v2 = vmul.f32 %v1504_v35, %v71_v63  ;;  %v101_v11 = vmul.f32 %v1504_v35, %v76_v10 }
  0xa2   :  { %v112_v3 = vadd.f32 %v1507_v39, %v100_v2  ;;  %v113_v13 = vadd.f32 %v1507_v39, %v101_v11 }
  0xa3   :  { %v86_v21 = vpop.permute.xlu0 %85 }
 0x108   :  { %v183_v41 = vpop.f32.mrb[0].mxu0 }
 0x109   :  { %v187_v42 = vadd.f32 %v183_v41, %v109_v40  ;;  %v890_v43 = vpop.f32.mrb[1].mxu0 }
 0x10b   :  { %1337 = vtanh.f32 %v187_v42 }
 0x115   :  { %v1338_v44 = vpop.eup %1337 }
 0x116   :  { %189 = vst [vmem:[%s1651_s3] sm:$0xff] %v1338_v44  ;;  %924 = vmatmul.mubr.f32.vlgmr.msra.gmra.mrb[0].mxu1 %v1338_v44 }
 0x117   :  { %1210 = vmatpush3.bf16.msra.mxu1 %v1422_v6  ;;  %993 = vmatprep.mubr.msk.f32.mxu1 %vm1381_vm0, %v1382_v1 }
 0x118   :  { %1211 = vmatprep.subr.bf16.mxu1 %v1380_v0 }
 0x11b   :  { %1213 = vmatpush3.bf16.msra.mxu1 %v1425_v8 }
 0x11c   :  { %1214 = vmatprep.subr.bf16.mxu1 %v1380_v0 }
 0x11f   :  { %1216 = vmatpush3.bf16.msra.mxu1 %v1434_v12 }
 0x120   :  { %1217 = vmatprep.subr.bf16.mxu1 %v1380_v0 }
 0x123   :  { %1219 = vmatpush3.bf16.msra.mxu1 %v1443_v16 }
 0x124   :  { %1220 = vmatprep.subr.bf16.mxu1 %v1380_v0 }
 0x127   :  { %1222 = vmatpush3.bf16.msra.mxu1 %v1452_v20 }
 0x128   :  { %1223 = vmatprep.subr.bf16.mxu1 %v1380_v0 }
 0x12b   :  { %1225 = vmatpush3.bf16.msra.mxu1 %v1461_v24 }
 0x12c   :  { %1226 = vmatprep.subr.bf16.mxu1 %v1380_v0 }
 0x12f   :  { %1228 = vmatpush3.bf16.msra.mxu1 %v1467_v27 }
 0x130   :  { %1229 = vmatprep.subr.bf16.mxu1 %v1380_v0 }
 0x133   :  { %1231 = vmatpush3.bf16.msra.mxu1 %v1473_v30 }
 0x134   :  { %1256 = vmatprep.subr.bf16.mxu1 %v1380_v0 }
 0x1e9   :  { %v256_v52 = vpop.f32.mrb[0].mxu1 }
 0x1ea   :  { %v260_v53 = vadd.f32 %v256_v52, %v110_v51  ;;  %v925_v54 = vpop.f32.mrb[1].mxu1 }
 0x1ec   :  { %1339 = vtanh.f32 %v260_v53 }
 0x1f6   :  { %v1340_v55 = vpop.eup %1339 }
 0x1f7   :  { %713 = vst [vmem:[%s1651_s3 + $0x8] sm:$0xff] %v1340_v55  ;;  %959 = vmatmul.mubr.f32.vlgmr.msra.gmra.mrb[2].mxu0 %v1340_v55 }
 0x1f8   :  { %1234 = vmatpush3.bf16.msra.mxu0 %v1422_v6  ;;  %1028 = vmatprep.mubr.msk.f32.mxu0 %vm1381_vm0, %v1382_v1 }
 0x1f9   :  { %1235 = vmatprep.subr.bf16.mxu0 %v1380_v0 }
 0x1fc   :  { %1237 = vmatpush3.bf16.msra.mxu0 %v1425_v8 }
 0x1fd   :  { %1238 = vmatprep.subr.bf16.mxu0 %v1380_v0 }
 0x200   :  { %1240 = vmatpush3.bf16.msra.mxu0 %v1434_v12 }
 0x201   :  { %1241 = vmatprep.subr.bf16.mxu0 %v1380_v0 }
 0x204   :  { %1243 = vmatpush3.bf16.msra.mxu0 %v1443_v16 }
 0x205   :  { %1244 = vmatprep.subr.bf16.mxu0 %v1380_v0 }
 0x208   :  { %1246 = vmatpush3.bf16.msra.mxu0 %v1452_v20 }
 0x209   :  { %1247 = vmatprep.subr.bf16.mxu0 %v1380_v0 }
 0x20c   :  { %1249 = vmatpush3.bf16.msra.mxu0 %v1461_v24 }
 0x20d   :  { %1250 = vmatprep.subr.bf16.mxu0 %v1380_v0 }
 0x210   :  { %1252 = vmatpush3.bf16.msra.mxu0 %v1467_v27 }
 0x211   :  { %1253 = vmatprep.subr.bf16.mxu0 %v1380_v0 }
 0x214   :  { %1255 = vmatpush3.bf16.msra.mxu0 %v1473_v30 }
 0x215   :  { %1280 = vmatprep.subr.bf16.mxu0 %v1380_v0 }
 0x2ca   :  { %v330_v59 = vpop.f32.mrb[2].mxu0 }
 0x2cb   :  { %v334_v60 = vadd.f32 %v330_v59, %v111_v58  ;;  %v960_v61 = vpop.f32.mrb[3].mxu0 }
 0x2cd   :  { %1341 = vtanh.f32 %v334_v60 }
 0x2d7   :  { %v1342_v62 = vpop.eup %1341 }
 0x2d8   :  { %714 = vst [vmem:[%s1651_s3 + $0x10] sm:$0xff] %v1342_v62  ;;  %994 = vmatmul.mubr.f32.vlgmr.msra.gmra.mrb[2].mxu1 %v1342_v62 }
 0x2d9   :  { %1258 = vmatpush3.bf16.msra.mxu1 %v1422_v6  ;;  %1063 = vmatprep.mubr.msk.f32.mxu1 %vm1381_vm0, %v1382_v1 }
 0x2da   :  { %1259 = vmatprep.subr.bf16.mxu1 %v1380_v0 }
 0x2dd   :  { %1261 = vmatpush3.bf16.msra.mxu1 %v1425_v8 }
 0x2de   :  { %1262 = vmatprep.subr.bf16.mxu1 %v1380_v0 }
 0x2e1   :  { %1264 = vmatpush3.bf16.msra.mxu1 %v1434_v12 }
 0x2e2   :  { %1265 = vmatprep.subr.bf16.mxu1 %v1380_v0 }
 0x2e5   :  { %1267 = vmatpush3.bf16.msra.mxu1 %v1443_v16 }
 0x2e6   :  { %1268 = vmatprep.subr.bf16.mxu1 %v1380_v0 }
 0x2e9   :  { %1270 = vmatpush3.bf16.msra.mxu1 %v1452_v20 }
 0x2ea   :  { %1271 = vmatprep.subr.bf16.mxu1 %v1380_v0 }
 0x2ed   :  { %1273 = vmatpush3.bf16.msra.mxu1 %v1461_v24 }
 0x2ee   :  { %1274 = vmatprep.subr.bf16.mxu1 %v1380_v0 }
 0x2f1   :  { %1276 = vmatpush3.bf16.msra.mxu1 %v1467_v27 }
 0x2f2   :  { %1277 = vmatprep.subr.bf16.mxu1 %v1380_v0 }
 0x2f5   :  { %1279 = vmatpush3.bf16.msra.mxu1 %v1473_v30 }
 0x2f6   :  { %1304 = vmatprep.subr.bf16.mxu1 %v1380_v0 }
 0x3ab   :  { %v404_v4 = vpop.f32.mrb[2].mxu1 }
 0x3ac   :  { %v408_v5 = vadd.f32 %v404_v4, %v112_v3  ;;  %v995_v7 = vpop.f32.mrb[3].mxu1 }
 0x3ae   :  { %1343 = vtanh.f32 %v408_v5 }
 0x3b8   :  { %v1344_v9 = vpop.eup %1343 }
 0x3b9   :  { %715 = vst [vmem:[%s1651_s3 + $0x18] sm:$0xff] %v1344_v9  ;;  %1029 = vmatmul.mubr.f32.vlgmr.msra.gmra.mrb[4].mxu0 %v1344_v9 }
 0x3ba   :  { %1282 = vmatpush3.bf16.msra.mxu0 %v1422_v6  ;;  %1098 = vmatprep.mubr.msk.f32.mxu0 %vm1381_vm0, %v1382_v1 }
 0x3bb   :  { %1283 = vmatprep.subr.bf16.mxu0 %v1380_v0 }
 0x3be   :  { %1285 = vmatpush3.bf16.msra.mxu0 %v1425_v8 }
 0x3bf   :  { %1286 = vmatprep.subr.bf16.mxu0 %v1380_v0 }
 0x3c2   :  { %1288 = vmatpush3.bf16.msra.mxu0 %v1434_v12 }
 0x3c3   :  { %1289 = vmatprep.subr.bf16.mxu0 %v1380_v0 }
 0x3c6   :  { %1291 = vmatpush3.bf16.msra.mxu0 %v1443_v16 }
 0x3c7   :  { %1292 = vmatprep.subr.bf16.mxu0 %v1380_v0 }
 0x3ca   :  { %1294 = vmatpush3.bf16.msra.mxu0 %v1452_v20 }
 0x3cb   :  { %1295 = vmatprep.subr.bf16.mxu0 %v1380_v0 }
 0x3ce   :  { %1297 = vmatpush3.bf16.msra.mxu0 %v1461_v24 }
 0x3cf   :  { %1298 = vmatprep.subr.bf16.mxu0 %v1380_v0 }
 0x3d2   :  { %1300 = vmatpush3.bf16.msra.mxu0 %v1467_v27 }
 0x3d3   :  { %1301 = vmatprep.subr.bf16.mxu0 %v1380_v0 }
 0x3d6   :  { %1303 = vmatpush3.bf16.msra.mxu0 %v1473_v30 }
 0x48c   :  { %v478_v14 = vpop.f32.mrb[4].mxu0 }
 0x48d   :  { %v482_v15 = vadd.f32 %v478_v14, %v113_v13  ;;  %v1030_v17 = vpop.f32.mrb[5].mxu0 }
 0x48f   :  { %1345 = vtanh.f32 %v482_v15 }
 0x499   :  { %v1346_v18 = vpop.eup %1345 }
 0x49a   :  { %716 = vst [vmem:[%s1651_s3 + $0x20] sm:$0xff] %v1346_v18  ;;  %1064 = vmatmul.mubr.f32.vlgmr.msra.gmra.mrb[4].mxu1 %v1346_v18 }
 0x49b   :  { %1306 = vmatpush3.bf16.msra.mxu1 %v1422_v6  ;;  %1133 = vmatprep.mubr.msk.f32.mxu1 %vm1381_vm0, %v1382_v1  ;;  %v81_v1 = vpop.permute.xlu1 %80 }
 0x49c   :  { %1307 = vmatprep.subr.bf16.mxu1 %v1380_v0  ;;  %v102_v6 = vmul.f32 %v1504_v35, %v81_v1 }
 0x49f   :  { %1309 = vmatpush3.bf16.msra.mxu1 %v1425_v8  ;;  %v114_v8 = vadd.f32 %v1507_v39, %v102_v6 }
 0x4a0   :  { %1310 = vmatprep.subr.bf16.mxu1 %v1380_v0 }
 0x4a3   :  { %1312 = vmatpush3.bf16.msra.mxu1 %v1434_v12 }
 0x4a4   :  { %1313 = vmatprep.subr.bf16.mxu1 %v1380_v0 }
 0x4a7   :  { %1315 = vmatpush3.bf16.msra.mxu1 %v1443_v16 }
 0x4a8   :  { %1316 = vmatprep.subr.bf16.mxu1 %v1380_v0 }
 0x4ab   :  { %1318 = vmatpush3.bf16.msra.mxu1 %v1452_v20 }
 0x4ac   :  { %1319 = vmatprep.subr.bf16.mxu1 %v1380_v0 }
 0x4af   :  { %1321 = vmatpush3.bf16.msra.mxu1 %v1461_v24 }
 0x4b0   :  { %1322 = vmatprep.subr.bf16.mxu1 %v1380_v0 }
 0x4b3   :  { %1324 = vmatpush3.bf16.msra.mxu1 %v1467_v27  ;;  %v91_v27 = vpop.permute.xlu1 %90 }
 0x4b4   :  { %1325 = vmatprep.subr.bf16.mxu1 %v1380_v0  ;;  %v103_v0 = vmul.f32 %v1504_v35, %v86_v21  ;;  %v104_v28 = vmul.f32 %v1504_v35, %v91_v27 }
 0x4b6   :  { %v115_v22 = vadd.f32 %v1507_v39, %v103_v0  ;;  %v116_v29 = vadd.f32 %v1507_v39, %v104_v28 }
 0x4b7   :  { %1327 = vmatpush3.bf16.msra.mxu1 %v1473_v30 }
 0x56d   :  { %v552_v12 = vpop.f32.mrb[4].mxu1 }
 0x56e   :  { %v556_v16 = vadd.f32 %v552_v12, %v114_v8  ;;  %v1065_v19 = vpop.f32.mrb[5].mxu1 }
 0x570   :  { %1347 = vtanh.f32 %v556_v16 }
 0x57a   :  { %v1348_v20 = vpop.eup %1347 }
 0x57b   :  { %717 = vst [vmem:[%s1651_s3 + $0x28] sm:$0xff] %v1348_v20  ;;  %1099 = vmatmul.mubr.f32.vlgmr.msra.gmra.mrb[6].mxu0 %v1348_v20 }
 0x64e   :  { %v626_v23 = vpop.f32.mrb[6].mxu0 }
 0x64f   :  { %v630_v24 = vadd.f32 %v626_v23, %v115_v22  ;;  %v1100_v25 = vpop.f32.mrb[7].mxu0 }
 0x651   :  { %1349 = vtanh.f32 %v630_v24 }
 0x65b   :  { %v1350_v26 = vpop.eup %1349 }
 0x65c   :  { %718 = vst [vmem:[%s1651_s3 + $0x30] sm:$0xff] %v1350_v26  ;;  %1134 = vmatmul.mubr.f32.vlgmr.msra.gmra.mrb[6].mxu1 %v1350_v26 }
 0x72f   :  { %v700_v30 = vpop.f32.mrb[6].mxu1 }
 0x730   :  { %v704_v31 = vadd.f32 %v700_v30, %v116_v29  ;;  %v1135_v32 = vpop.f32.mrb[7].mxu1 }
 0x732   :  { %1351 = vtanh.f32 %v704_v31 }
 0x73c   :  { %v1352_v33 = vpop.eup %1351 }
 0x73d   :  { %719 = vst [vmem:[%s1651_s3 + $0x38] sm:$0xff] %v1352_v33 }
 0x73e   :  { %712 = vsyncpa [#allocation3], 1 }

</bundles_post_ra>
